<compile_context>
chip_gen: v6e
topology: v6e:2x2x1
jax: 0.10.0
libtpu: 0.0.40
codegen_flags: <defaults>
</compile_context>

<pallas_src>
import math
import numpy as np
import jax
import jax.numpy as jnp
from jax.experimental import pallas as pl
from jax.experimental.pallas import tpu as pltpu


# ---------------------------------------------------------------------------
# Deterministic parameter construction (mirrors FDLayer.get_dct_filter)
# ---------------------------------------------------------------------------
def _build_filter(pos, freq, POS):
    result = math.cos(math.pi * freq * (pos + 0.5) / POS) / math.sqrt(POS)
    if freq == 0:
        return result
    return result * math.sqrt(2)


def get_dct_filter(tile_size_x, tile_size_y, mapper_x, mapper_y, channel):
    assert len(mapper_x) == len(mapper_y)
    assert channel % len(mapper_x) == 0
    dct_filter = np.zeros((channel, tile_size_x, tile_size_y), dtype=np.float32)
    c_part = channel // len(mapper_x)
    for i, (u_x, v_y) in enumerate(zip(mapper_x, mapper_y)):
        for t_x in range(tile_size_x):
            for t_y in range(tile_size_y):
                dct_filter[i * c_part:(i + 1) * c_part, t_x, t_y] = (
                    _build_filter(t_x, u_x, tile_size_x)
                    * _build_filter(t_y, v_y, tile_size_y)
                )
    return jnp.asarray(dct_filter)


# ---------------------------------------------------------------------------
# Kernels: elementwise multiply + spatial reduction over a (TN, TC) tile.
# Stays on VPU + XLU (no MXU benefit for an elementwise-reduce); bf16 inputs
# are upcast after load and accumulated in f32.
# ---------------------------------------------------------------------------
def _fd_kernel_hw_lanes(x_ref, w_ref, o_ref):
    # x_ref: (TN, TC, HW), w_ref: (TC, HW), o_ref: (TN, TC).  Reduce over lanes.
    x = x_ref[...].astype(jnp.float32)
    w = w_ref[...].astype(jnp.float32)
    o_ref[...] = jnp.sum(x * w[None, :, :], axis=-1).astype(o_ref.dtype)


def _fd_kernel_c_lanes(x_ref, w_ref, o_ref):
    # x_ref: (TN, HW, TC), w_ref: (HW, TC), o_ref: (TN, TC).  Reduce sublanes.
    x = x_ref[...].astype(jnp.float32)
    w = w_ref[...].astype(jnp.float32)
    o_ref[...] = jnp.sum(x * w[None, :, :], axis=1).astype(o_ref.dtype)


# ---------------------------------------------------------------------------
# Tiling helpers
# ---------------------------------------------------------------------------
def _round_up(v, m):
    return -(-v // m) * m


def _vmem_budget_bytes():
    """Generation-aware total VMEM budget (<= ~3/4 of physical, capped)."""
    try:
        phys = pltpu.get_tpu_info().vmem_capacity_bytes
    except Exception:
        phys = 64 * 1024 * 1024          # v7x per-TensorCore VMEM; safe floor
    return int(min((phys * 3) // 4, 96 * 1024 * 1024))


def _choose_tn(n, row_cost_bytes, x_budget_bytes, other_steps, min_total_steps=8):
    """Batch-tile rows: multiple of 8 (sublane-dense output), budget-driven."""
    if n <= 8:
        return n                          # block == full batch extent is legal
    tn = int(x_budget_bytes // max(1, row_cost_bytes))
    tn = max(8, (min(tn, n) // 8) * 8)
    # Keep enough grid steps for pipelining and for both v7x TensorCores.
    while tn > 8 and other_steps * pl.cdiv(n, tn) < min_total_steps:
        tn = max(8, ((tn // 2) // 8) * 8)
    if n % tn:
        # Prefer a nearby multiple of 8 that divides N (no ragged final block).
        for cand in range(tn, max(8, tn // 2) - 1, -8):
            if n % cand == 0:
                return cand
    return tn


# ---------------------------------------------------------------------------
# Wrapper
# ---------------------------------------------------------------------------
def fd_layer_forward(x, weight, data_format="NCHW"):
    """FDLayer forward.

    data_format="NCHW": x (N, C, H, W)  -- matches the PyTorch module.
    data_format="NHWC": x (N, H, W, C)  -- channels-last fast path (lane-dense
                                           C); no transpose of x is ever issued.
    weight: (C, H, W).  Returns (N, C).
    """
    assert x.ndim == 4, "x must be 4-D"
    if data_format == "NCHW":
        N, C, H, W = x.shape
    elif data_format == "NHWC":
        N, H, W, C = x.shape
    else:
        raise ValueError(f"unknown data_format: {data_format}")
    assert weight.shape == (C, H, W)
    HW = H * W

    x_isz = x.dtype.itemsize
    w_isz = weight.dtype.itemsize
    sub_x = max(8, 32 // x_isz)           # sublane multiple for x's dtype
    sub_w = max(8, 32 // w_isz)
    out_dtype = jnp.promote_types(x.dtype, weight.dtype)

    if data_format == "NCHW":
        # Native layout: (N, C, HW); reduce over the lane (HW) axis.  Reshape
        # is free -- no HBM transpose copy of x.
        x_flat = x.reshape(N, C, HW)
        w_flat = weight.reshape(C, HW)
        kernel = _fd_kernel_hw_lanes
        per_row = lambda tc: _round_up(tc, sub_x) * _round_up(HW, 128) * x_isz
        w_bytes = lambda tc: _round_up(tc, sub_w) * _round_up(HW, 128) * w_isz
        x_block = lambda tn, tc: (tn, tc, HW)
        x_index = lambda c, n: (n, c, 0)
        w_block = lambda tc: (tc, HW)
        w_index = lambda c, n: (c, 0)
    else:
        # Channels-last: (N, HW, C); reduce over sublanes, C stays lane-dense.
        # Only the tiny weight is transposed (C*HW elements), never x.
        x_flat = x.reshape(N, HW, C)
        w_flat = weight.reshape(C, HW).T
        kernel = _fd_kernel_c_lanes
        per_row = lambda tc: _round_up(HW, sub_x) * _round_up(tc, 128) * x_isz
        w_bytes = lambda tc: _round_up(HW, sub_w) * _round_up(tc, 128) * w_isz
        x_block = lambda tn, tc: (tn, HW, tc)
        x_index = lambda c, n: (n, 0, c)
        w_block = lambda tc: (HW, tc)
        w_index = lambda c, n: (0, c)

    total_budget = _vmem_budget_bytes()

    # Per-batch-row VMEM cost: 2 pipeline buffers + margin for a fused temp,
    # plus the double-buffered f32 output row.
    row_cost = lambda tc: 3 * per_row(tc) + 2 * _round_up(tc, 128) * 4
    x_budget = lambda tc: total_budget - 2 * w_bytes(tc) - 2 * 1024 * 1024

    # Split the channel axis (128-multiples, keeping the output lane-dense)
    # only when even a minimum batch tile would not fit.
    n_min = N if N < 8 else 8
    tc = C
    while tc > 128 and n_min * row_cost(tc) > x_budget(tc):
        tc = max(128, _round_up(tc // 2, 128))
    # TODO(synk): extreme shapes (C <= 128 with enormous H*W) would also need
    # an accumulation split over the spatial axis; not needed for any
    # FcaNet-style configuration.

    c_blocks = pl.cdiv(C, tc)
    tn = _choose_tn(N, row_cost(tc), x_budget(tc), other_steps=c_blocks)
    n_blocks = pl.cdiv(N, tn)

    cost = pl.CostEstimate(
        flops=2 * N * C * HW,
        transcendentals=0,
        bytes_accessed=N * C * HW * x_isz + C * HW * w_isz
        + N * C * jnp.dtype(out_dtype).itemsize,
    )

    return pl.pallas_call(
        kernel,
        out_shape=jax.ShapeDtypeStruct((N, C), out_dtype),
        grid_spec=pltpu.PrefetchScalarGridSpec(
            num_scalar_prefetch=0,
            grid=(c_blocks, n_blocks),     # weight block constant in inner loop
            in_specs=[
                pl.BlockSpec(x_block(tn, tc), x_index),
                # Constant index along n: re-DMA'd only when the c block
                # changes (usually never).  Kept default-buffered for compile
                # safety; its padded footprint is counted in the budget.
                pl.BlockSpec(w_block(tc), w_index),
            ],
            out_specs=pl.BlockSpec((tn, tc), lambda c, n: (n, c)),
        ),
        compiler_params=pltpu.CompilerParams(
            dimension_semantics=("parallel", "parallel"),
            vmem_limit_bytes=int(total_budget),
        ),
        cost_estimate=cost,
    )(x_flat, w_flat)


if __name__ == "__main__":
    key = jax.random.PRNGKey(0)

    # --- 1) Small NCHW demo matching the PyTorch module (hw-lanes path) -----
    N, C, H, W = 2, 4, 16, 16
    weight = get_dct_filter(H, W, [0, 1], [0, 1], C)
    key, k1 = jax.random.split(key)
    x = jax.random.normal(k1, (N, C, H, W), dtype=jnp.float32)

    out = jax.block_until_ready(fd_layer_forward(x, weight))
    ref = jnp.sum(x * weight[None, :, :, :], axis=(2, 3))
    assert out.shape == (N, C)
    assert jnp.allclose(out, ref, atol=1e-4, rtol=1e-4), "mismatch (NCHW path)"

    # --- 2) Channels-last fast path (lane-dense C, c-lanes kernel) ----------
    N2, C2, H2, W2 = 4, 128, 4, 4
    weight2 = get_dct_filter(H2, W2, [0, 1], [0, 1], C2)
    key, k2 = jax.random.split(key)
    x2_nchw = jax.random.normal(k2, (N2, C2, H2, W2), dtype=jnp.float32)
    x2_nhwc = jnp.transpose(x2_nchw, (0, 2, 3, 1))   # test-side layout only

    out2 = jax.block_until_ready(fd_layer_forward(x2_nhwc, weight2, data_format="NHWC"))
    ref2 = jnp.sum(x2_nchw * weight2[None, :, :, :], axis=(2, 3))
    assert out2.shape == (N2, C2)
    assert jnp.allclose(out2, ref2, atol=1e-4, rtol=1e-4), "mismatch (NHWC path)"

    # --- 3) bf16 input path (upcast in-kernel, f32 accumulation) ------------
    key, k3 = jax.random.split(key)
    x3 = jax.random.normal(k3, (N, C, H, W), dtype=jnp.bfloat16)
    out3 = jax.block_until_ready(fd_layer_forward(x3, weight))
    ref3 = jnp.sum(x3.astype(jnp.float32) * weight[None, :, :, :], axis=(2, 3))
    assert out3.shape == (N, C)
    assert jnp.allclose(out3, ref3, atol=5e-2, rtol=5e-2), "mismatch (bf16 path)"

    print("KERNEL_OK")
</pallas_src>

<mosaic_0001>
module attributes {stable_mosaic.version = 11 : i64} {
  func.func @_fd_kernel_hw_lanes(%arg0: i32, %arg1: i32, %arg2: memref<2x4x256xf32, #tpu.memory_space<vmem>>, %arg3: memref<4x256xf32, #tpu.memory_space<vmem>>, %arg4: memref<2x4xf32, #tpu.memory_space<vmem>>) attributes {dimension_semantics = [#tpu.dimension_semantics<parallel>, #tpu.dimension_semantics<parallel>], iteration_bounds = array<i64: 1, 1>, scalar_prefetch = 0 : i64, scratch_operands = 0 : i64, tpu.core_type = #tpu.core_type<tc>, window_params = [{transform_indices = @transform_0, window_bounds = array<i64: 2, 4, 256>}, {transform_indices = @transform_1, window_bounds = array<i64: 4, 256>}, {transform_indices = @transform_2, window_bounds = array<i64: 2, 4>}]} {
    %c0 = arith.constant 0 : index
    %c0_0 = arith.constant 0 : index
    %c0_1 = arith.constant 0 : index
    %0 = vector.load %arg2[%c0, %c0_0, %c0_1] : memref<2x4x256xf32, #tpu.memory_space<vmem>>, vector<2x4x256xf32>
    %c0_2 = arith.constant 0 : index
    %c0_3 = arith.constant 0 : index
    %1 = vector.load %arg3[%c0_2, %c0_3] : memref<4x256xf32, #tpu.memory_space<vmem>>, vector<4x256xf32>
    %2 = vector.shape_cast %1 : vector<4x256xf32> to vector<1x4x256xf32>
    %3 = vector.broadcast %2 : vector<1x4x256xf32> to vector<2x4x256xf32>
    %4 = arith.mulf %0, %3 : vector<2x4x256xf32>
    %cst = arith.constant dense<0.000000e+00> : vector<2x4xf32>
    %5 = vector.multi_reduction <add>, %4, %cst [2] : vector<2x4x256xf32> to vector<2x4xf32>
    %c0_4 = arith.constant 0 : index
    %c0_5 = arith.constant 0 : index
    %6 = vector.load %arg4[%c0_4, %c0_5] : memref<2x4xf32, #tpu.memory_space<vmem>>, vector<2x4xf32>
    tpu.vector_store %arg4[%c0_4, %c0_5], %5 {strides = array<i32>} : memref<2x4xf32, #tpu.memory_space<vmem>>, vector<2x4xf32>,
    return
  }
  func.func @transform_0(%arg0: i32, %arg1: i32) -> (i32, i32, i32) {
    %c0_i32 = arith.constant 0 : i32
    %c0_i32_0 = arith.constant 0 : i32
    return %arg1, %arg0, %c0_i32 : i32, i32, i32
  }
  func.func @transform_1(%arg0: i32, %arg1: i32) -> (i32, i32) {
    %c0_i32 = arith.constant 0 : i32
    %c0_i32_0 = arith.constant 0 : i32
    return %arg0, %c0_i32 : i32, i32
  }
  func.func @transform_2(%arg0: i32, %arg1: i32) -> (i32, i32) {
    %c0_i32 = arith.constant 0 : i32
    return %arg1, %arg0 : i32, i32
  }
}

</mosaic_0001>

<bundles_post_ra>
// kernel: tpu_custom_call.1
= control target key start
LH: loop header
LB: loop body
LE: loop exit
PB: predicated region body
PF: predicated region fallthrough
CT: control target
= control target key end

     0   :  { %7 = vsyncpa [#allocation3], 0  ;;  %s193_s0 = inlined_call_operand.hbm [shape: f32[2,4,256], index: 0, kind: input, shape index: {}]   ;;  %s194_s1 = inlined_call_operand.hbm [shape: f32[4,256], index: 1, kind: input, shape index: {}]   ;;  %s195_s2 = inlined_call_operand.hbm [shape: f32[2,4], index: 2, kind: output, shape index: {}]  }
   0x1   :  { %8 = vsyncpa [#allocation6], 0 }
   0x2   :  { %9 = vsyncpa [#allocation4], 0  ;;  %s164_s9 = smov [#allocation2]  }
   0x3   :  { %s15_s10 = sshll.u32 %s164_s9, 4  ;;  %s16_s10 = int_to_ptr.vmem [resolvable:$true] %s15_s10 }
   0x4   :  { %s106_s11 = scalar_lea.vmem %s16_s10, 256  ;;  %p111_p1 = scmp.lt.s32.totalorder %s16_s10, %s16_s10 }
   0x5   :  { %p107_p0 = scmp.ne.s32.totalorder %s16_s10, %s106_s11  ;;  %p112_p2 = scmp.lt.s32.totalorder %s106_s11, %s106_s11 }
   0x7   :  { %p113_p3 = por %p112_p2, %p111_p1 }
   0x9   :  { %p114_p4 = pnand %p113_p3, %p107_p0 }
   0xb   :  { %117 = shalt.err (!%p114_p4)
}
   0xc   :  { %s165_s12 = smov 128   ;;  %s166_s13 = smov 8  }
   0xd   :  { %21 = dma.hbm_to_vmem [thread:$0]  %s193_s0, 256, %s16_s10, [#allocation3], %s165_s12, %s165_s12, %s166_s13  }
   0xe   :  { %s167_s16 = smov [#allocation5]  }
   0xf   :  { %s28_s17 = sshll.u32 %s167_s16, 4  ;;  %s29_s17 = int_to_ptr.vmem [resolvable:$true] %s28_s17 }
  0x10   :  { %s126_s18 = scalar_lea.vmem %s29_s17, 128  ;;  %p131_p6 = scmp.lt.s32.totalorder %s29_s17, %s29_s17 }
  0x11   :  { %p127_p5 = scmp.ne.s32.totalorder %s29_s17, %s126_s18  ;;  %p132_p7 = scmp.lt.s32.totalorder %s126_s18, %s126_s18 }
  0x13   :  { %p133_p8 = por %p132_p7, %p131_p6 }
  0x15   :  { %p134_p9 = pnand %p133_p8, %p127_p5 }
  0x17   :  { %137 = shalt.err (!%p134_p9)
}
  0x18   :  { %31 = dma.hbm_to_vmem [thread:$0]  %s194_s1, 128, %s29_s17, [#allocation6]  }
  0x19   :  { %158 = dma.done.wait [#allocation3], 256  }
  0x1a   :  { %159 = vsyncadd [#allocation3], 4294967040 }
  0x1b   :  { %160 = dma.done.wait [#allocation6], 128  }
  0x1c   :  { %161 = vsyncadd [#allocation6], 4294967168  ;;  %v38_v0 = vld [vmem:[#allocation2] sm:$0xff]  ;;  %v40_v1 = vld [vmem:[#allocation5] sm:$0xff]  ;;  %vm49_vm0 = vcmask 1043456   ;;  %v62_v13 = vlaneseq  ;;  %s168_s0 = smov [#allocation7]  }
  0x1d   :  { %v39_v2 = vld [vmem:[#allocation2 + $0x8] sm:$0xff]  ;;  %v41_v3 = vmul.f32 %v40_v1, %v38_v0  ;;  %s83_s1 = sshll.u32 %s168_s0, 4  ;;  %vm72_vm1 = vcmask 1041409   ;;  %vm75_vm2 = vcmask 25600   ;;  %s84_s1 = int_to_ptr.vmem [resolvable:$true] %s83_s1 }
  0x1e   :  { %v42_v4 = vmul.f32 %v40_v1, %v39_v2  ;;  %v63_v14 = vand.u32 127, %v62_v13  ;;  %v65_v15 = vshrl.u32 %v62_v13, 7  ;;  %s138_s21 = scalar_lea.vmem %s84_s1, 32  ;;  %p143_p11 = scmp.lt.s32.totalorder %s84_s1, %s84_s1 }
  0x1f   :  { %v45_v5 = vcombine.high %v41_v3, %v41_v3  ;;  %v50_v6 = vsel %vm49_vm0, %v41_v3, 0.0  ;;  %p139_p10 = scmp.ne.s32.totalorder %s84_s1, %s138_s21  ;;  %p144_p12 = scmp.lt.s32.totalorder %s138_s21, %s138_s21 }
  0x20   :  { %v46_v7 = vcombine.high %v42_v4, %v42_v4  ;;  %v55_v9 = vsel %vm49_vm0, %v42_v4, 0.0  ;;  %v66_v17 = vsub.s32 %v63_v14, %v65_v15 }
  0x21   :  { %v51_v8 = vsel %vm49_vm0, %v45_v5, 0.0  ;;  %p145_p13 = por %p144_p12, %p143_p11 }
  0x22   :  { %v56_v10 = vsel %vm49_vm0, %v46_v7, 0.0  ;;  %v52_v11 = vadd.f32 %v51_v8, %v50_v6 }
  0x23   :  { %v57_v12 = vadd.f32 %v56_v10, %v55_v9  ;;  %p146_p0 = pnand %p145_p13, %p139_p10 }
  0x24   :  { %53 = vadd.xlane.f32.xlu0 %v52_v11 }
  0x28   :  { %58 = vadd.xlane.f32.xlu0 %v57_v12 }
  0xad   :  { %v54_v16 = vpop.xlane.xlu0 %53 }
  0xae   :  { %v67_v19 = vrot.slane %v54_v16, %v66_v17 }
  0xb1   :  { %v59_v18 = vpop.xlane.xlu0 %58 }
  0xb2   :  { %v71_v20 = vrot.slane %v59_v18, %v66_v17 }
  0xb4   :  { %v73_v21 = vsel %vm72_vm1, %v71_v20, %v67_v19 }
  0xb5   :  { %76 = vst.msk [vmem:[#allocation7] sm:$0x3] %vm75_vm2, %v73_v21 }
  0xb6   :  { %149 = shalt.err (!%p146_p0)
}
  0xb7   :  { %86 = dma.vmem_to_hbm [thread:$0]  %s84_s1, 32, %s195_s2, [#allocation4]  }
  0xb8   :  { %162 = dma.done.wait [#allocation4], 32  }
  0xb9   :  { %163 = vsyncadd [#allocation4], 4294967264 }
  0xba   :  { %90 = vsyncpa [#allocation3], 1 }
  0xbb   :  { %91 = vsyncpa [#allocation6], 1 }
  0xbc   :  { %92 = vsyncpa [#allocation4], 1 }

</bundles_post_ra>
